<compile_context>
chip_gen: v6e
topology: v6e:2x2x1
jax: 0.10.0
libtpu: 0.0.40
codegen_flags: <defaults>
</compile_context>

<pallas_src>
import functools

import jax
import jax.numpy as jnp
from jax.experimental import pallas as pl
from jax.experimental.pallas import tpu as pltpu


def _round_up(n, m):
    return ((n + m - 1) // m) * m


_GOLDEN = 0x9E3779B1
_LAYER_SALT = 0x85EBCA77


def _hash_u32(x):
    """splitmix32-style finalizer on uint32 arrays (plain VPU int ops)."""
    x = x ^ (x >> 16)
    x = x * jnp.uint32(0x7FEB352D)
    x = x ^ (x >> 15)
    x = x * jnp.uint32(0x846CA68B)
    x = x ^ (x >> 16)
    return x


def _mlp_kernel(seed_ref, *refs, num_hidden, dropout_rate, training, tile_b):
    # refs = [x, (w,b) * num_hidden, w_last_row, b_last, out]
    x_ref = refs[0]
    out_ref = refs[-1]
    param_refs = refs[1:-1]

    h = x_ref[...].astype(jnp.float32)

    use_dropout = training and dropout_rate > 0.0 and num_hidden > 0
    if use_dropout:
        thr = jnp.uint32(min(int(round(dropout_rate * (2.0 ** 32))), 2 ** 32 - 1))
        # Hoisted once per tile (not per layer): counter base at the widest
        # hidden width.  Per layer only a scalar salt is added before hashing.
        max_w = max(param_refs[2 * l].shape[1] for l in range(num_hidden))
        seed_u = seed_ref[0].astype(jnp.uint32)
        row_base = (pl.program_id(0) * tile_b).astype(jnp.uint32)
        rows = jax.lax.broadcasted_iota(jnp.int32, (tile_b, max_w), 0).astype(jnp.uint32)
        cols = jax.lax.broadcasted_iota(jnp.int32, (tile_b, max_w), 1).astype(jnp.uint32)
        base_ctr = (rows + row_base) * jnp.uint32(_GOLDEN) + cols + seed_u

    for layer in range(num_hidden):
        w = param_refs[2 * layer][...]          # (in, out)
        b = param_refs[2 * layer + 1][...]      # (1, out)
        h = jnp.dot(h.astype(w.dtype), w, preferred_element_type=jnp.float32)
        h = h + b.astype(jnp.float32)
        h = jnp.maximum(h, 0.0)                 # ReLU
        if use_dropout:
            width = w.shape[1]
            # Python-side salt kept inside uint32 range (fixes the previous
            # OverflowError for layer >= 1).
            salt = jnp.uint32(((layer + 1) * _LAYER_SALT) & 0xFFFFFFFF)
            bits = _hash_u32(base_ctr[:, :width] + salt)
            # 1/(1-p) is folded into the next layer's weights in the wrapper,
            # so dropout here is a single select (no multiply).
            h = jnp.where(bits >= thr, h, jnp.float32(0.0))
        # eval mode: dropout is identity.

    # Final Linear(prev, 1): broadcast multiply + lane reduce (XLU), avoiding
    # an N=1 MXU pass.
    w_last = param_refs[-2][...].astype(jnp.float32)   # (1, prev) -- transposed in wrapper
    b_last = param_refs[-1][...].astype(jnp.float32)   # (1, 1)
    y = jnp.sum(h * w_last, axis=-1, keepdims=True) + b_last
    out_ref[...] = y.astype(out_ref.dtype)


def _vmem_cap_bytes():
    """Generation-aware VMEM cap: ~40 MiB on v7x (64 MiB physical), ~100 MiB on
    v5e/v6e (128 MiB).  Conservative fallback when no TPU is queryable."""
    try:
        cap = int(pltpu.get_tpu_info().vmem_capacity_bytes)
    except Exception:
        return 48 * 1024 * 1024
    if cap <= 64 * 1024 * 1024:
        return 40 * 1024 * 1024
    return 100 * 1024 * 1024


def _choose_tile_b(batch, input_size, max_width, param_bytes, x_itemsize, vmem_cap):
    """Largest multiple-of-8 batch tile that fits the VMEM budget, capped so the
    grid has >=2 steps for batch >= 16 (v7x megacore)."""
    per_row = 2 * input_size * x_itemsize + 2 * x_itemsize + 6 * max_width * 4
    fixed = 2 * param_bytes                 # resident params (double-buffered)
    budget = int(vmem_cap * 0.6)            # headroom for compiler scratch
    tile_b = (budget - fixed) // max(per_row, 1)
    tile_b = min(tile_b, 8192, _round_up(batch, 8))
    if batch >= 16:
        tile_b = min(tile_b, _round_up(pl.cdiv(batch, 2), 8))
    return max(8, (int(tile_b) // 8) * 8)


def init_params(key, input_size, hidden_layers, dtype=jnp.float32):
    """Deterministic init mimicking torch.nn.Linear (uniform +-1/sqrt(fan_in)).
    Weights stored as (in_features, out_features)."""
    if isinstance(hidden_layers, int):
        hidden_layers = [hidden_layers]
    sizes = [input_size] + list(hidden_layers) + [1]
    params = []
    for fan_in, fan_out in zip(sizes[:-1], sizes[1:]):
        key, kw, kb = jax.random.split(key, 3)
        bound = 1.0 / (fan_in ** 0.5)
        w = jax.random.uniform(kw, (fan_in, fan_out), dtype, -bound, bound)
        b = jax.random.uniform(kb, (1, fan_out), dtype, -bound, bound)
        params.append((w, b))
    return params


def neural_network_forward(x, params, dropout_rate, *, training=False, seed=0,
                           tile_b=None):
    """x: (batch, input_size) -> (batch, 1).  Whole MLP fused in one Pallas
    kernel, batch-tiled over a 1-D parallel grid with resident weights."""
    batch, input_size = x.shape
    num_hidden = len(params) - 1
    dropout_rate = float(dropout_rate)

    widths = [w.shape[1] for w, _ in params]
    max_width = max(widths + [input_size, 128])
    param_bytes = sum(int(w.size) * w.dtype.itemsize + int(b.size) * b.dtype.itemsize
                      for w, b in params)
    vmem_cap = _vmem_cap_bytes()

    if tile_b is None:
        tile_b = _choose_tile_b(batch, input_size, max_width, param_bytes,
                                x.dtype.itemsize, vmem_cap)
    else:
        tile_b = max(8, min(_round_up(int(tile_b), 8), _round_up(batch, 8)))

    # No jnp.pad of x: partial last block is handled by Pallas block masking.
    num_tiles = pl.cdiv(batch, tile_b)

    # Flatten params; head weight stored lane-major as (1, prev).  In training
    # mode fold the dropout rescale 1/(1-p) into every weight that consumes a
    # dropped-out activation (all layers except the first).
    fold_scale = (training and dropout_rate > 0.0 and num_hidden > 0)
    scale = 1.0 / (1.0 - dropout_rate) if fold_scale else 1.0
    flat_params = []
    for i, (w, b) in enumerate(params):
        wi = w.T if i == num_hidden else w
        if i >= 1 and scale != 1.0:
            wi = (wi.astype(jnp.float32) * jnp.float32(scale)).astype(w.dtype)
        flat_params.append(wi)
        flat_params.append(b)

    kernel = functools.partial(
        _mlp_kernel,
        num_hidden=num_hidden,
        dropout_rate=dropout_rate,
        training=bool(training),
        tile_b=tile_b,
    )

    seed_arr = jnp.array([seed], dtype=jnp.int32)

    # x / out stream per grid step; params use constant index_maps -> resident.
    x_spec = pl.BlockSpec((tile_b, input_size), lambda i, s: (i, 0))
    param_specs = [pl.BlockSpec(p.shape, lambda i, s: (0, 0)) for p in flat_params]
    out_spec = pl.BlockSpec((tile_b, 1), lambda i, s: (i, 0))

    est = int(1.5 * (2 * tile_b * (input_size + 1) * x.dtype.itemsize
                     + 6 * tile_b * max_width * 4
                     + 2 * param_bytes))
    vmem_limit = int(min(vmem_cap, max(4 * 1024 * 1024, est)))

    out = pl.pallas_call(
        kernel,
        out_shape=jax.ShapeDtypeStruct((batch, 1), x.dtype),
        grid_spec=pltpu.PrefetchScalarGridSpec(
            num_scalar_prefetch=1,
            grid=(num_tiles,),
            in_specs=[x_spec] + param_specs,
            out_specs=out_spec,
        ),
        compiler_params=pltpu.CompilerParams(
            dimension_semantics=("parallel",),
            vmem_limit_bytes=vmem_limit,
        ),
    )(seed_arr, x, *flat_params)

    return out


def _reference_forward(x, params):
    """Pure-JAX eval-mode reference (dropout = identity)."""
    h = x.astype(jnp.float32)
    for i, (w, b) in enumerate(params):
        h = h @ w + b
        if i < len(params) - 1:
            h = jnp.maximum(h, 0.0)
    return h.astype(x.dtype)


if __name__ == "__main__":
    input_size = 16
    hidden_layers = [32, 32]
    dropout_rate = 0.1
    batch = 70          # not a multiple of 8 / tile -> exercises partial-tile masking

    key = jax.random.PRNGKey(0)
    key_p, key_x = jax.random.split(key)

    params = init_params(key_p, input_size, hidden_layers)
    x = jax.random.normal(key_x, (batch, input_size), dtype=jnp.float32)

    y_ref = _reference_forward(x, params)

    # Eval mode, auto (VMEM-aware) tile: 2 grid steps for batch=70.
    y = jax.block_until_ready(
        neural_network_forward(x, params, dropout_rate, training=False))
    assert y.shape == (batch, 1)
    assert jnp.allclose(y, y_ref, atol=1e-5, rtol=1e-5)

    # Eval mode, small explicit tile: multi-tile grid with a partial last tile.
    y_small = jax.block_until_ready(
        neural_network_forward(x, params, dropout_rate, training=False, tile_b=16))
    assert jnp.allclose(y_small, y_ref, atol=1e-5, rtol=1e-5)

    # Training-mode forward exercises in-kernel dropout (deterministic per seed,
    # distinct mask per batch tile via the global-row-based counter).
    # TODO(synk): random stream cannot bit-match torch's RNG; statistics match.
    y_train = jax.block_until_ready(
        neural_network_forward(x, params, dropout_rate, training=True, seed=42))
    assert y_train.shape == (batch, 1)
    assert bool(jnp.all(jnp.isfinite(y_train)))

    print("KERNEL_OK")
</pallas_src>

<mosaic_0001>
module attributes {stable_mosaic.version = 11 : i64} {
  func.func @_mlp_kernel(%arg0: i32, %arg1: memref<1xi32, #tpu.memory_space<smem>>, %arg2: memref<40x16xf32, #tpu.memory_space<vmem>>, %arg3: memref<16x32xf32, #tpu.memory_space<vmem>>, %arg4: memref<1x32xf32, #tpu.memory_space<vmem>>, %arg5: memref<32x32xf32, #tpu.memory_space<vmem>>, %arg6: memref<1x32xf32, #tpu.memory_space<vmem>>, %arg7: memref<1x32xf32, #tpu.memory_space<vmem>>, %arg8: memref<1x1xf32, #tpu.memory_space<vmem>>, %arg9: memref<40x1xf32, #tpu.memory_space<vmem>>) attributes {dimension_semantics = [#tpu.dimension_semantics<parallel>], iteration_bounds = array<i64: 2>, scalar_prefetch = 1 : i64, scratch_operands = 0 : i64, tpu.core_type = #tpu.core_type<tc>, window_params = [{transform_indices = @transform_0, window_bounds = array<i64: 40, 16>}, {pipeline_mode = #tpu.pipeline_mode<synchronous>, transform_indices = @transform_1, window_bounds = array<i64: 16, 32>}, {pipeline_mode = #tpu.pipeline_mode<synchronous>, transform_indices = @transform_2, window_bounds = array<i64: 1, 32>}, {pipeline_mode = #tpu.pipeline_mode<synchronous>, transform_indices = @transform_3, window_bounds = array<i64: 32, 32>}, {pipeline_mode = #tpu.pipeline_mode<synchronous>, transform_indices = @transform_4, window_bounds = array<i64: 1, 32>}, {pipeline_mode = #tpu.pipeline_mode<synchronous>, transform_indices = @transform_5, window_bounds = array<i64: 1, 32>}, {pipeline_mode = #tpu.pipeline_mode<synchronous>, transform_indices = @transform_6, window_bounds = array<i64: 1, 1>}, {transform_indices = @transform_7, window_bounds = array<i64: 40, 1>}]} {
    %c0 = arith.constant 0 : index
    %c0_0 = arith.constant 0 : index
    %0 = vector.load %arg2[%c0, %c0_0] : memref<40x16xf32, #tpu.memory_space<vmem>>, vector<40x16xf32>
    %c0_1 = arith.constant 0 : index
    %c0_2 = arith.constant 0 : index
    %1 = vector.load %arg3[%c0_1, %c0_2] : memref<16x32xf32, #tpu.memory_space<vmem>>, vector<16x32xf32>
    %c0_3 = arith.constant 0 : index
    %c0_4 = arith.constant 0 : index
    %2 = vector.load %arg4[%c0_3, %c0_4] : memref<1x32xf32, #tpu.memory_space<vmem>>, vector<1x32xf32>
    %cst = arith.constant dense<0.000000e+00> : vector<40x32xf32>
    %3 = tpu.matmul %0, %1, %cst {dimension_numbers = #tpu.dot_dimension_numbers<[1], [0], [0], [1], [0, 0, 1, 1], [], []>} : vector<40x16xf32>, vector<16x32xf32>, vector<40x32xf32> -> vector<40x32xf32>
    %4 = vector.broadcast %2 : vector<1x32xf32> to vector<40x32xf32>
    %5 = arith.addf %3, %4 : vector<40x32xf32>
    %cst_5 = arith.constant 0.000000e+00 : f32
    %6 = vector.broadcast %cst_5 : f32 to vector<40x32xf32>
    %7 = arith.maximumf %5, %6 : vector<40x32xf32>
    %c0_6 = arith.constant 0 : index
    %c0_7 = arith.constant 0 : index
    %8 = vector.load %arg5[%c0_6, %c0_7] : memref<32x32xf32, #tpu.memory_space<vmem>>, vector<32x32xf32>
    %c0_8 = arith.constant 0 : index
    %c0_9 = arith.constant 0 : index
    %9 = vector.load %arg6[%c0_8, %c0_9] : memref<1x32xf32, #tpu.memory_space<vmem>>, vector<1x32xf32>
    %cst_10 = arith.constant dense<0.000000e+00> : vector<40x32xf32>
    %10 = tpu.matmul %7, %8, %cst_10 {dimension_numbers = #tpu.dot_dimension_numbers<[1], [0], [0], [1], [0, 0, 1, 1], [], []>} : vector<40x32xf32>, vector<32x32xf32>, vector<40x32xf32> -> vector<40x32xf32>
    %11 = vector.broadcast %9 : vector<1x32xf32> to vector<40x32xf32>
    %12 = arith.addf %10, %11 : vector<40x32xf32>
    %cst_11 = arith.constant 0.000000e+00 : f32
    %13 = vector.broadcast %cst_11 : f32 to vector<40x32xf32>
    %14 = arith.maximumf %12, %13 : vector<40x32xf32>
    %c0_12 = arith.constant 0 : index
    %c0_13 = arith.constant 0 : index
    %15 = vector.load %arg7[%c0_12, %c0_13] : memref<1x32xf32, #tpu.memory_space<vmem>>, vector<1x32xf32>
    %c0_14 = arith.constant 0 : index
    %c0_15 = arith.constant 0 : index
    %16 = vector.load %arg8[%c0_14, %c0_15] : memref<1x1xf32, #tpu.memory_space<vmem>>, vector<1x1xf32>
    %17 = vector.broadcast %15 : vector<1x32xf32> to vector<40x32xf32>
    %18 = arith.mulf %14, %17 : vector<40x32xf32>
    %cst_16 = arith.constant dense<0.000000e+00> : vector<40xf32>
    %19 = vector.multi_reduction <add>, %18, %cst_16 [1] : vector<40x32xf32> to vector<40xf32>
    %20 = vector.shape_cast %19 : vector<40xf32> to vector<40x1xf32>
    %21 = vector.broadcast %16 : vector<1x1xf32> to vector<40x1xf32>
    %22 = arith.addf %20, %21 : vector<40x1xf32>
    %c0_17 = arith.constant 0 : index
    %c0_18 = arith.constant 0 : index
    %23 = vector.load %arg9[%c0_17, %c0_18] : memref<40x1xf32, #tpu.memory_space<vmem>>, vector<40x1xf32>
    tpu.vector_store %arg9[%c0_17, %c0_18], %22 {strides = array<i32>} : memref<40x1xf32, #tpu.memory_space<vmem>>, vector<40x1xf32>,
    return
  }
  func.func @transform_0(%arg0: i32, %arg1: memref<1xi32, #tpu.memory_space<smem>>) -> (i32, i32) {
    %c0_i32 = arith.constant 0 : i32
    %c0_i32_0 = arith.constant 0 : i32
    return %arg0, %c0_i32 : i32, i32
  }
  func.func @transform_1(%arg0: i32, %arg1: memref<1xi32, #tpu.memory_space<smem>>) -> (i32, i32) {
    %c0_i32 = arith.constant 0 : i32
    %c0_i32_0 = arith.constant 0 : i32
    %c0_i32_1 = arith.constant 0 : i32
    return %c0_i32, %c0_i32_0 : i32, i32
  }
  func.func @transform_2(%arg0: i32, %arg1: memref<1xi32, #tpu.memory_space<smem>>) -> (i32, i32) {
    %c0_i32 = arith.constant 0 : i32
    %c0_i32_0 = arith.constant 0 : i32
    %c0_i32_1 = arith.constant 0 : i32
    return %c0_i32, %c0_i32_0 : i32, i32
  }
  func.func @transform_3(%arg0: i32, %arg1: memref<1xi32, #tpu.memory_space<smem>>) -> (i32, i32) {
    %c0_i32 = arith.constant 0 : i32
    %c0_i32_0 = arith.constant 0 : i32
    %c0_i32_1 = arith.constant 0 : i32
    return %c0_i32, %c0_i32_0 : i32, i32
  }
  func.func @transform_4(%arg0: i32, %arg1: memref<1xi32, #tpu.memory_space<smem>>) -> (i32, i32) {
    %c0_i32 = arith.constant 0 : i32
    %c0_i32_0 = arith.constant 0 : i32
    %c0_i32_1 = arith.constant 0 : i32
    return %c0_i32, %c0_i32_0 : i32, i32
  }
  func.func @transform_5(%arg0: i32, %arg1: memref<1xi32, #tpu.memory_space<smem>>) -> (i32, i32) {
    %c0_i32 = arith.constant 0 : i32
    %c0_i32_0 = arith.constant 0 : i32
    %c0_i32_1 = arith.constant 0 : i32
    return %c0_i32, %c0_i32_0 : i32, i32
  }
  func.func @transform_6(%arg0: i32, %arg1: memref<1xi32, #tpu.memory_space<smem>>) -> (i32, i32) {
    %c0_i32 = arith.constant 0 : i32
    %c0_i32_0 = arith.constant 0 : i32
    %c0_i32_1 = arith.constant 0 : i32
    return %c0_i32, %c0_i32_0 : i32, i32
  }
  func.func @transform_7(%arg0: i32, %arg1: memref<1xi32, #tpu.memory_space<smem>>) -> (i32, i32) {
    %c0_i32 = arith.constant 0 : i32
    %c0_i32_0 = arith.constant 0 : i32
    return %arg0, %c0_i32 : i32, i32
  }
}

</mosaic_0001>

<bundles_post_ra>
// kernel: tpu_custom_call.1
= control target key start
LH: loop header
LB: loop body
LE: loop exit
PB: predicated region body
PF: predicated region fallthrough
CT: control target
= control target key end

     0   :  { %s1323_s0 = inlined_call_operand.<no memory space> [shape: s32[1], index: 0, kind: input, shape index: {}]   ;;  %s1324_s1 = inlined_call_operand.vmem [shape: f32[70,16], index: 1, kind: input, shape index: {}]   ;;  %s1325_s2 = inlined_call_operand.vmem [shape: f32[16,32], index: 2, kind: input, shape index: {}]   ;;  %s1326_s3 = inlined_call_operand.vmem [shape: f32[1,32], index: 3, kind: input, shape index: {}]   ;;  %s1327_s4 = inlined_call_operand.vmem [shape: f32[32,32], index: 4, kind: input, shape index: {}]   ;;  %s1328_s5 = inlined_call_operand.vmem [shape: f32[1,32], index: 5, kind: input, shape index: {}]   ;;  %s1329_s6 = inlined_call_operand.vmem [shape: f32[1,32], index: 6, kind: input, shape index: {}]   ;;  %s1330_s7 = inlined_call_operand.<no memory space> [shape: f32[1,1], index: 7, kind: input, shape index: {}]   ;;  %s1331_s8 = inlined_call_operand.vmem [shape: f32[70,1], index: 8, kind: output, shape index: {}]  }
   0x1   :  { %v14_v0 = vstv %s1330_s7 }
   0x2   :  { %15 = vst [vmem:[#allocation4] sm:$0x1] %v14_v0 }
   0x3   :  { %s1154_s28 = smov 0   ;;  %s1156_s29 = smov 0  }
   0x4   :  { %s1158_s30 = smov 0  }
   0x5 LB: > { %s1167_s7 = sadd.s32 4294967295, %s1070_s30   ;;  %s1169_s9 = sadd.s32 1, %s1070_s30   ;;  %s1070_s30 = sphi %s1158_s30, %s1338_s30   ;;  %s1066_s29 = sphi %s1156_s29, %s1337_s29   ;;  %s1062_s28 = sphi %s1154_s28, %s1336_s28  }
   0x6   : > { %s177_s10 = ssub.s32 %s1070_s30, %s1169_s9  ;;  %s180_s11 = sadd.s32 1, %s1066_s29 }
   0x7   : > { %p178_p0 = scmp.eq.s32.totalorder %s177_s10, 0  ;;  %p190_p1 = scmp.ne.s32.totalorder %s1066_s29, %s1062_s28 }
   0x8   : > { %p191_p2 = scmp.eq.s32.totalorder %s1167_s7, 1  ;;  %p833_p3 = scmp.ge.s32.totalorder %s1070_s30, 1 }
   0x9   : > { %s1177_s12 = scalar_select %p178_p0, %s1066_s29, %s180_s11  }
   0xa   : > { %p1179_p4 = por %p191_p2, %p190_p1  ;;  %p250_p5 = scmp.lt.s32.totalorder %s1070_s30, 3 }
   0xc   : > { %p251_p6 = pnand %p833_p3, %p250_p5 }
   0xd   : > { %s1187_s16 = smul.u32 (!%p251_p6), 5, %s1167_s7 }
   0xe   : > { %254 = sbr.rel (%p251_p6) target bundleno = 631 (0x277), region = 48 }
   0xf   : > { %p290_p7 = scmp.lt.s32.totalorder (!%p251_p6), %s1187_s16, 8 }
  0x13   : > { %v310_v1 = vld [vmem:[%s1325_s2 + $0x8] sm:$0xff]  ;;  %v1104_v2 = vmov 0.0   ;;  %v309_v3 = vld [vmem:[%s1325_s2] sm:$0xff]  ;;  %vm1105_vm0 = vmmov 0   ;;  %v432_v4 = vld [vmem:[%s1327_s4 + $0x18] sm:$0xff]  ;;  %s291_s21 = scalar_select %p290_p7, %s1187_s16, 8 }
  0x14   : > { %878 = vmatprep.subr.mxu0 %v1104_v2  ;;  %882 = vmatprep.mubr.msk.f32.mxu0 %vm1105_vm0, %v1104_v2  ;;  %vm318_vm1 = vcmask 130048   ;;  %v431_v10 = vld [vmem:[%s1327_s4 + $0x10] sm:$0xff]  ;;  %v430_v11 = vld [vmem:[%s1327_s4 + $0x8] sm:$0xff]  ;;  %v429_v12 = vld [vmem:[%s1327_s4] sm:$0xff]  ;;  %vm440_vm2 = vcmask 261120   ;;  %vm590_vm3 = vcmask 7168  }
  0x15   : > { %879 = vmatpush3.msra.mxu0 %v310_v1  ;;  %897 = vmatprep.subr.mxu1 %v1104_v2  ;;  %s834_s22 = sshll.u32 %s291_s21, 3  ;;  %v835_v13 = vld [vmem:[%s1326_s3] ss:$0 sm:$0xff]  ;;  %s282_s21 = sand.u32 1, %s1062_s28  }
  0x16   : > { %880 = vmatprep.subr.mxu0 %v1104_v2  ;;  %898 = vmatpush3.msra.mxu1 %v432_v4  ;;  %s293_s24 = scalar_lea.vmem %s1324_s1, %s834_s22  ;;  %v841_v34 = vld [vmem:[%s1328_s5] ss:$0 sm:$0xff]  ;;  %s920_s22 = smul.u32 40, %s282_s21 }
  0x17   : > { %881 = vmatpush3.msra.mxu0 %v309_v3  ;;  %899 = vmatprep.subr.mxu1 %v1104_v2  ;;  %v304_v5 = vld [vmem:[%s293_s24] sm:$0xff]  ;;  %v305_v6 = vld [vmem:[%s293_s24 + $0x8] sm:$0xff]  ;;  %v306_v7 = vld [vmem:[%s293_s24 + $0x10] sm:$0xff]  ;;  %s604_s28 = ssub.s32 (%p1179_p4), 9, %s1187_s16  ;;  %s861_s0 = smul.u32 (%p1179_p4), 40, %s1167_s7 }
  0x18   : > { %905 = vmatprep.mubr.msk.f32.mxu1 %vm1105_vm0, %v1104_v2  ;;  %883 = vmatmul.mubr.msk.f32.vlgmr.msra.gmra.mxu0 %vm318_vm1, %v304_v5  ;;  %v307_v8 = vld [vmem:[%s293_s24 + $0x18] sm:$0xff]  ;;  %v308_v9 = vld [vmem:[%s293_s24 + $0x20] sm:$0xff]  ;;  %s1255_s23 = scalar_lea.vmem [#allocation5], %s920_s22   ;;  %p605_p8 = scmp.lt.s32.totalorder (%p1179_p4), %s604_s28, 5 }
  0x19   : > { %885 = vmatprep.mubr.msk.f32.mxu0 %vm1105_vm0, %v1104_v2  ;;  %900 = vmatpush3.msra.mxu1 %v431_v10  ;;  %v847_v38 = vld [vmem:[%s1329_s6] ss:$0 sm:$0xff]  ;;  %s1274_s26 = scalar_lea.vmem (%p1179_p4), %s1331_s8, %s861_s0  }
  0x1a   : > { %901 = vmatprep.subr.mxu1 %v1104_v2 }
  0x1b   : > { %902 = vmatpush3.msra.mxu1 %v430_v11 }
  0x1c   : > { %886 = vmatmul.mubr.msk.f32.gmra.mxu0 %vm318_vm1, %v305_v6  ;;  %903 = vmatprep.subr.mxu1 %v1104_v2 }
  0x1d   : > { %888 = vmatprep.mubr.msk.f32.mxu0 %vm1105_vm0, %v1104_v2  ;;  %904 = vmatpush3.msra.mxu1 %v429_v12 }
  0x20   : > { %889 = vmatmul.mubr.msk.f32.gmra.mxu0 %vm318_vm1, %v306_v7 }
  0x21   : > { %891 = vmatprep.mubr.msk.f32.mxu0 %vm1105_vm0, %v1104_v2 }
  0x24   : > { %892 = vmatmul.mubr.msk.f32.gmra.mxu0 %vm318_vm1, %v307_v8 }
  0x25   : > { %894 = vmatprep.mubr.msk.f32.mxu0 %vm1105_vm0, %v1104_v2 }
  0x28   : > { %895 = vmatmul.mubr.msk.f32.gmra.mxu0 %vm318_vm1, %v308_v9 }
  0xd8   : > { %v400_v14 = vpop.f32.mrf.mxu0 }
  0xd9   : > { %v401_v15 = vadd.f32 %v835_v13, %v400_v14 }
  0xda   : > { %v884_v16 = vpop.f32.mrf.mxu0 }
  0xdb   : > { %v424_v17 = vmax.f32 %v401_v15, 0.0 }
  0xdc   : > { %v405_v18 = vpop.f32.mrf.mxu0 }
  0xdd   : > { %v406_v19 = vadd.f32 %v835_v13, %v405_v18  ;;  %906 = vmatmul.mubr.msk.f32.vlgmr.msra.gmra.mxu1 %vm440_vm2, %v424_v17 }
  0xde   : > { %v887_v20 = vpop.f32.mrf.mxu0  ;;  %908 = vmatprep.mubr.msk.f32.mxu1 %vm1105_vm0, %v1104_v2 }
  0xdf   : > { %v425_v21 = vmax.f32 %v406_v19, 0.0 }
  0xe0   : > { %v410_v22 = vpop.f32.mrf.mxu0 }
  0xe1   : > { %v411_v23 = vadd.f32 %v835_v13, %v410_v22  ;;  %909 = vmatmul.mubr.msk.f32.gmra.mxu1 %vm440_vm2, %v425_v21 }
  0xe2   : > { %v890_v24 = vpop.f32.mrf.mxu0  ;;  %911 = vmatprep.mubr.msk.f32.mxu1 %vm1105_vm0, %v1104_v2 }
  0xe3   : > { %v426_v25 = vmax.f32 %v411_v23, 0.0 }
  0xe4   : > { %v415_v26 = vpop.f32.mrf.mxu0 }
  0xe5   : > { %v416_v27 = vadd.f32 %v835_v13, %v415_v26  ;;  %912 = vmatmul.mubr.msk.f32.gmra.mxu1 %vm440_vm2, %v426_v25 }
  0xe6   : > { %v893_v28 = vpop.f32.mrf.mxu0  ;;  %914 = vmatprep.mubr.msk.f32.mxu1 %vm1105_vm0, %v1104_v2 }
  0xe7   : > { %v427_v29 = vmax.f32 %v416_v27, 0.0 }
  0xe8   : > { %v420_v30 = vpop.f32.mrf.mxu0 }
  0xe9   : > { %v421_v31 = vadd.f32 %v835_v13, %v420_v30  ;;  %915 = vmatmul.mubr.msk.f32.gmra.mxu1 %vm440_vm2, %v427_v29 }
  0xea   : > { %v896_v32 = vpop.f32.mrf.mxu0  ;;  %917 = vmatprep.mubr.msk.f32.mxu1 %vm1105_vm0, %v1104_v2  ;;  %v848_v2 = vld [vmem:[#allocation4] ss:$0 sm:$0xff] }
  0xeb   : > { %v428_v33 = vmax.f32 %v421_v31, 0.0 }
  0xed   : > { %918 = vmatmul.mubr.msk.f32.gmra.mxu1 %vm440_vm2, %v428_v33 }
 0x19d   : > { %v522_v35 = vpop.f32.mrf.mxu1 }
 0x19e   : > { %v523_v36 = vadd.f32 %v841_v34, %v522_v35 }
 0x19f   : > { %v907_v37 = vpop.f32.mrf.mxu1 }
 0x1a0   : > { %v546_v39 = vmax.f32 %v523_v36, 0.0 }
 0x1a1   : > { %v527_v40 = vpop.f32.mrf.mxu1 }
 0x1a2   : > { %v528_v41 = vadd.f32 %v841_v34, %v527_v40  ;;  %v559_v42 = vmul.f32 %v847_v38, %v546_v39 }
 0x1a3   : > { %v910_v43 = vpop.f32.mrf.mxu1 }
 0x1a4   : > { %v547_v44 = vmax.f32 %v528_v41, 0.0  ;;  %v564_v45 = vsel %vm440_vm2, %v559_v42, 0.0 }
 0x1a5   : > { %565 = vadd.xlane.f32.xlu0 %v564_v45  ;;  %v532_v46 = vpop.f32.mrf.mxu1 }
 0x1a6   : > { %v533_v47 = vadd.f32 %v841_v34, %v532_v46  ;;  %v560_v48 = vmul.f32 %v847_v38, %v547_v44 }
 0x1a7   : > { %v913_v49 = vpop.f32.mrf.mxu1 }
 0x1a8   : > { %v548_v50 = vmax.f32 %v533_v47, 0.0  ;;  %v567_v51 = vsel %vm440_vm2, %v560_v48, 0.0 }
 0x1a9   : > { %568 = vadd.xlane.f32.xlu0 %v567_v51  ;;  %v537_v52 = vpop.f32.mrf.mxu1 }
 0x1aa   : > { %v538_v53 = vadd.f32 %v841_v34, %v537_v52  ;;  %v561_v54 = vmul.f32 %v847_v38, %v548_v50 }
 0x1ab   : > { %v916_v55 = vpop.f32.mrf.mxu1 }
 0x1ac   : > { %v549_v56 = vmax.f32 %v538_v53, 0.0  ;;  %v570_v57 = vsel %vm440_vm2, %v561_v54, 0.0 }
 0x1ad   : > { %571 = vadd.xlane.f32.xlu1 %v570_v57  ;;  %v542_v58 = vpop.f32.mrf.mxu1 }
 0x1ae   : > { %v543_v59 = vadd.f32 %v841_v34, %v542_v58  ;;  %v562_v60 = vmul.f32 %v847_v38, %v549_v56 }
 0x1af   : > { %v919_v61 = vpop.f32.mrf.mxu1 }
 0x1b0   : > { %v550_v62 = vmax.f32 %v543_v59, 0.0  ;;  %v573_v63 = vsel %vm440_vm2, %v562_v60, 0.0 }
 0x1b1   : > { %574 = vadd.xlane.f32.xlu1 %v573_v63 }
 0x1b2   : > { %v563_v0 = vmul.f32 %v847_v38, %v550_v62 }
 0x1b4   : > { %v576_v1 = vsel %vm440_vm2, %v563_v0, 0.0 }
 0x1b5   : > { %577 = vadd.xlane.f32.xlu0 %v576_v1 }
 0x22e   : > { %v566_v3 = vpop.xlane.xlu0 %565 }
 0x22f   : > { %v585_v4 = vadd.f32 %v848_v2, %v566_v3 }
 0x231   : > { %591 = vst.msk [vmem:[%s1255_s23] sm:$0xff] %vm590_vm3, %v585_v4 }
 0x232   : > { %v569_v5 = vpop.xlane.xlu0 %568 }
 0x233   : > { %v586_v6 = vadd.f32 %v848_v2, %v569_v5 }
 0x235   : > { %592 = vst.msk [vmem:[%s1255_s23 + $0x8] sm:$0xff] %vm590_vm3, %v586_v6 }
 0x236   : > { %v572_v7 = vpop.xlane.xlu1 %571 }
 0x237   : > { %v587_v8 = vadd.f32 %v848_v2, %v572_v7 }
 0x239   : > { %593 = vst.msk [vmem:[%s1255_s23 + $0x10] sm:$0xff] %vm590_vm3, %v587_v8 }
 0x23a   : > { %v575_v9 = vpop.xlane.xlu1 %574 }
 0x23b   : > { %v588_v10 = vadd.f32 %v848_v2, %v575_v9 }
 0x23d   : > { %594 = vst.msk [vmem:[%s1255_s23 + $0x18] sm:$0xff] %vm590_vm3, %v588_v10  ;;  %602 = sbr.rel (!%p1179_p4) target bundleno = 631 (0x277), region = 52 }
 0x23e   : > { %v578_v11 = vpop.xlane.xlu0 %577 }
 0x23f   : > { %v589_v12 = vadd.f32 %v848_v2, %v578_v11 }
 0x241   : > { %595 = vst.msk [vmem:[%s1255_s23 + $0x20] sm:$0xff] %vm590_vm3, %v589_v12 }
 0x242   : > { %s1340_s28 = smov (!%p605_p8, %s604_s28), 5 }
 0x243   : > { %s849_s27 = sshll.u32 %s1340_s28, 7 }
 0x244   : > { %p852_p9 = scmp.eq.s32.totalorder %s849_s27, 0 }
 0x245   : > { %1012 = sdivrem.u32 (!%p852_p9), %s1340_s28, 5 }
 0x246   : > { %613 = sbr.rel (%p852_p9) target bundleno = 631 (0x277), region = 56 }
 0x24e   : > { %s1280_s13 = spop.drf %1012 }
 0x24f   : > { %p853_p10 = scmp.le.s32.totalorder %s1280_s13, 0 }
 0x250   : > { %s1333_s7 = smov (!%p853_p10), %s1274_s26  ;;  %s1334_s16 = smov (!%p853_p10), %s1255_s23 }
 0x251   : > { %786 = sbr.rel (%p853_p10) target bundleno = 606 (0x25e), region = 132  ;;  %s1289_s30 = smov (!%p853_p10), 0  }
 0x252   : > { %s1291_s10 = smov (!%p853_p10), 0  }
 0x256 LB: >> { %v686_v13 = vld [vmem:[%s1078_s16] sm:$0xff]  ;;  %v688_v14 = vld [vmem:[%s1078_s16 + $0x8] sm:$0xff]  ;;  %v690_v15 = vld [vmem:[%s1078_s16 + $0x10] sm:$0xff]  ;;  %s696_s11 = sadd.s32 1, %s1082_s30  ;;  %s680_s10 = sadd.s32 1, %s1086_s10   ;;  %s1086_s10 = sphi %s1291_s10, %s680_s10   ;;  %s1082_s30 = sphi %s1289_s30, %s1335_s30   ;;  %s1078_s16 = sphi %s1334_s16, %s701_s16   ;;  %s1074_s7 = sphi %s1333_s7, %s702_s7  }
 0x257   : >> { %687 = vst [vmem:[%s1074_s7] sm:$0xff] %v686_v13  ;;  %689 = vst [vmem:[%s1074_s7 + $0x8] sm:$0xff] %v688_v14  ;;  %v692_v16 = vld [vmem:[%s1078_s16 + $0x18] sm:$0xff]  ;;  %v694_v17 = vld [vmem:[%s1078_s16 + $0x20] sm:$0xff]  ;;  %p697_p11 = scmp.ge.s32.totalorder %s696_s11, %s1280_s13  ;;  %p679_p12 = scmp.ge.s32.totalorder %s680_s10, %s1280_s13 }
 0x258   : >> { %691 = vst [vmem:[%s1074_s7 + $0x10] sm:$0xff] %v690_v15  ;;  %693 = vst [vmem:[%s1074_s7 + $0x18] sm:$0xff] %v692_v16 }
 0x259   : >> { %695 = vst [vmem:[%s1074_s7 + $0x20] sm:$0xff] %v694_v17  ;;  %s1342_s11 = smov (%p697_p11, %s696_s11), 0  ;;  %682 = sbr.rel (!%p679_p12) target bundleno = 598 (0x256), region = 138 }
 0x25a   : >> { %s699_s14 = smul.u32 40, %s1342_s11  ;;  %s1335_s30 = smov %s1342_s11 }
 0x25c   : >> { %s701_s16 = scalar_lea.vmem %s1255_s23, %s699_s14 [#allocation5]   ;;  %s702_s7 = scalar_lea.vmem %s1274_s26, %s699_s14  }
 0x25e PF: > { %1014 = sdivrem.u32 %s1340_s28, 5 }
 0x25f   : > { %s854_s15 = smul.u32 40, %s1280_s13 }
 0x261   : > { %s707_s17 = scalar_lea.vmem %s1255_s23, %s854_s15 [#allocation5]   ;;  %s709_s18 = scalar_lea.vmem %s1274_s26, %s854_s15  }
 0x267   : > { %s1015_s19 = spop.drf %1014 }
 0x268   : > { %p856_p13 = scmp.le.s32.totalorder %s1015_s19, 0 }
 0x269   : > { %s1088_s20 = smov (!%p856_p13), %s709_s18   ;;  %s1092_s21 = smov (!%p856_p13), %s707_s17  }
 0x26a   : > { %800 = sbr.rel (%p856_p13) target bundleno = 631 (0x277), region = 143  ;;  %s1096_s22 = smov (!%p856_p13), 0  }
 0x26b   : > { %s1100_s0 = smov (!%p856_p13), 0  }
 0x26f LB: >> { %v719_v18 = vld [vmem:[%s1094_s21] sm:$0xff]  ;;  %s721_s24 = sadd.s32 1, %s1098_s22  ;;  %s713_s0 = sadd.s32 1, %s1102_s0   ;;  %s1102_s0 = sphi %s1100_s0, %s713_s0   ;;  %s1098_s22 = sphi %s1096_s22, %s1097_s22   ;;  %s1094_s21 = sphi %s1092_s21, %s726_s21   ;;  %s1090_s20 = sphi %s1088_s20, %s727_s20  }
 0x270   : >> { %720 = vst [vmem:[%s1090_s20] sm:$0xff] %v719_v18  ;;  %p722_p0 = scmp.ge.s32.totalorder %s721_s24, %s1015_s19  ;;  %p712_p1 = scmp.ge.s32.totalorder %s713_s0, %s1015_s19 }
 0x272   : >> { %s1344_s24 = smov (%p722_p0, %s721_s24), 0  ;;  %715 = sbr.rel (!%p712_p1) target bundleno = 623 (0x26f), region = 149 }
 0x273   : >> { %s857_s23 = sshll.u32 %s1344_s24, 3  ;;  %s1097_s22 = smov %s1344_s24  }
 0x274   : >> { %s726_s21 = scalar_lea.vmem %s707_s17, %s857_s23 [#allocation5]   ;;  %s727_s20 = scalar_lea.vmem %s709_s18, %s857_s23  }
 0x277 PF: > { %p18_p2 = scmp.ge.s32.totalorder %s1169_s9, 4   ;;  %s1336_s28 = smov %s1066_s29 }
 0x278   : > { %s1337_s29 = smov %s1177_s12  ;;  %s1338_s30 = smov %s1169_s9 }
 0x279   :  { %20 = sbr.rel (!%p18_p2) target bundleno = 5 (0x5), region = 160 }

</bundles_post_ra>
